<compile_context>
chip_gen: v6e
topology: v6e:2x2x1
jax: 0.10.0
libtpu: 0.0.40
codegen_flags: <defaults>
</compile_context>

<pallas_src>
import functools

import jax
import jax.numpy as jnp
from jax.experimental import pallas as pl
from jax.experimental.pallas import tpu as pltpu

_LANE = 128


def _mlp_kernel(x_ref, w1_ref, b1_ref, w2_ref, b2_ref, w3_ref, b3_ref,
                o_ref, acc_ref, *, apply_softmax: bool, x_resident: bool):
    k = pl.program_id(0)

    @pl.when(k == 0)
    def _():
        # Seed the accumulator with the layer-1 bias (epilogue add for free).
        acc_ref[...] = jnp.broadcast_to(b1_ref[...], acc_ref.shape)

    if x_resident:
        # x block is [n_k, B, tk]; pick this step's [B, tk] slab.
        x_tile = x_ref[k]
    else:
        # x block is already the streamed [B, tk] tile.
        x_tile = x_ref[...]

    # Layer-1 partial product: x_tile @ w1_tile^T (w1 streamed as [H, tk],
    # lane-dense along F).  bf16 MXU, f32 accumulate.
    acc_ref[...] += jax.lax.dot_general(
        x_tile, w1_ref[...],
        dimension_numbers=(((1,), (1,)), ((), ())),
        preferred_element_type=jnp.float32)

    @pl.when(k == pl.num_programs(0) - 1)
    def _():
        # Layer 1 epilogue: ReLU (bias already folded into the accumulator).
        h = jnp.maximum(acc_ref[...], 0.0)

        # Layer 2: Linear + ReLU (bf16 matmul, f32 accumulate).
        h = jnp.dot(h.astype(w2_ref.dtype), w2_ref[...],
                    preferred_element_type=jnp.float32) + b2_ref[...]
        h = jnp.maximum(h, 0.0)

        # Layer 3: output head.
        out = jnp.dot(h.astype(w3_ref.dtype), w3_ref[...],
                      preferred_element_type=jnp.float32) + b3_ref[...]

        if apply_softmax:
            # torch.nn.Softmax(dim=0): softmax over the batch axis. Exact,
            # since the entire batch is resident in this block.  Padded
            # output columns are sliced away outside and do not affect the
            # real (columnwise) softmax values.
            m = jnp.max(out, axis=0, keepdims=True)
            e = jnp.exp(out - m)
            out = e * pl.reciprocal(jnp.sum(e, axis=0, keepdims=True),
                                    approx=True)

        o_ref[...] = out.astype(o_ref.dtype)


def _round_up(n, m):
    return ((n + m - 1) // m) * m


def _pad2(a, rows, cols):
    return jnp.pad(a, ((0, rows - a.shape[0]), (0, cols - a.shape[1])))


def _vmem_bytes(B, F_pad, tk, H, O_pad, x_resident):
    """Conservative VMEM footprint of one pipelined step (double-buffered)."""
    bf16, f32 = 2, 4
    x_bytes = 2 * B * (F_pad if x_resident else tk) * bf16
    w1_stream = 2 * H * tk * bf16
    resident = 2 * ((H * H + H * O_pad) * bf16 + (2 * H + O_pad) * f32)
    out_acc = 2 * B * O_pad * f32 + B * H * f32
    return x_bytes + w1_stream + resident + out_acc


def prepare_mlp_params(params, batch, *, tk_max=8192, vmem_target=28 << 20):
    """One-time layout prep (pad + bf16 cast), hoisted out of the forward path.

    params use PyTorch-native layout:
      w1 [H, F], b1 [H], w2 [H, H], b2 [H], w3 [O, H], b3 [O]
    Returns (prepared_arrays, meta).
    """
    H, F = params["w1"].shape
    O = params["w3"].shape[0]
    B = int(batch)

    O_pad = _round_up(O, _LANE)

    # Keep x fully resident in VMEM when it is small; else stream it.
    x_resident = 2 * B * _round_up(F, _LANE) * 2 <= (8 << 20)

    # Layer-1 reduction tile: 128-aligned, as large as the VMEM target allows
    # (large tiles keep the stream bandwidth-bound, not per-step-overhead
    # bound; ~28 MiB target keeps v7x's 64 MiB physical VMEM comfortable).
    tk = min(_round_up(int(tk_max), _LANE), _round_up(F, _LANE))
    while tk > _LANE and _vmem_bytes(B, _round_up(F, tk), tk, H, O_pad,
                                     x_resident) > vmem_target:
        tk -= _LANE
    F_pad = _round_up(F, tk)
    n_k = F_pad // tk

    prepared = {
        # w1 stays [out, in] = [H, F_pad]: lane-dense along the streamed F axis.
        "w1": _pad2(params["w1"], H, F_pad).astype(jnp.bfloat16),
        "b1": params["b1"].reshape(1, H).astype(jnp.float32),
        # w2 / w3 are tiny residents, stored [in, out] for plain x @ W.
        "w2": params["w2"].T.astype(jnp.bfloat16),
        "b2": params["b2"].reshape(1, H).astype(jnp.float32),
        "w3": _pad2(params["w3"].T, H, O_pad).astype(jnp.bfloat16),
        "b3": _pad2(params["b3"].reshape(1, O), 1, O_pad).astype(jnp.float32),
    }
    meta = dict(B=B, F=F, F_pad=F_pad, H=H, O=O, O_pad=O_pad, tk=tk, n_k=n_k,
                x_resident=x_resident,
                vmem_bytes=_vmem_bytes(B, F_pad, tk, H, O_pad, x_resident))
    return prepared, meta


def mlp_forward(x, prepared, meta, *, softmax=False):
    """Fused 3-layer MLP forward (single pipelined Pallas kernel)."""
    B, F, F_pad = meta["B"], meta["F"], meta["F_pad"]
    H, O, O_pad = meta["H"], meta["O"], meta["O_pad"]
    tk, n_k, x_resident = meta["tk"], meta["n_k"], meta["x_resident"]
    assert x.shape == (B, F), (x.shape, (B, F))

    # x changes every call, so its (tiny) pad + cast stays in the forward path.
    x_p = _pad2(x, B, F_pad).astype(jnp.bfloat16)
    if x_resident:
        # [n_k, B, tk]: per-step access in the kernel is a first-axis index.
        x_arg = x_p.reshape(B, n_k, tk).transpose(1, 0, 2)
        x_spec = pl.BlockSpec((n_k, B, tk), lambda k: (0, 0, 0))
    else:
        x_arg = x_p
        x_spec = pl.BlockSpec((B, tk), lambda k: (0, k))

    in_specs = [
        x_spec,                                          # x
        pl.BlockSpec((H, tk), lambda k: (0, k)),         # w1: stream F tiles
        pl.BlockSpec((1, H), lambda k: (0, 0)),          # b1
        pl.BlockSpec((H, H), lambda k: (0, 0)),          # w2 (resident)
        pl.BlockSpec((1, H), lambda k: (0, 0)),          # b2
        pl.BlockSpec((H, O_pad), lambda k: (0, 0)),      # w3 (resident)
        pl.BlockSpec((1, O_pad), lambda k: (0, 0)),      # b3
    ]

    cost = pl.CostEstimate(
        flops=2 * B * (F * H + H * H + H * O),
        transcendentals=(B * O) if softmax else 0,
        bytes_accessed=int(H * F_pad * 2 + B * F_pad * 2
                           + (H * H + H * O_pad) * 2
                           + (2 * H + O_pad) * 4 + B * O_pad * 4),
    )

    vmem_limit = int(min(max(meta["vmem_bytes"] + (8 << 20), 16 << 20),
                         40 << 20))

    kernel = functools.partial(_mlp_kernel, apply_softmax=softmax,
                               x_resident=x_resident)

    out_padded = pl.pallas_call(
        kernel,
        out_shape=jax.ShapeDtypeStruct((B, O_pad), jnp.float32),
        grid_spec=pltpu.PrefetchScalarGridSpec(
            num_scalar_prefetch=0,
            grid=(n_k,),
            in_specs=in_specs,
            # Constant output index over the reduction axis; the kernel only
            # writes at the last k.  Correct because the axis is "arbitrary".
            out_specs=pl.BlockSpec((B, O_pad), lambda k: (0, 0)),
            scratch_shapes=[pltpu.VMEM((B, H), jnp.float32)],
        ),
        compiler_params=pltpu.CompilerParams(
            dimension_semantics=("arbitrary",),   # F axis is a reduction
            vmem_limit_bytes=vmem_limit,
        ),
        cost_estimate=cost,
    )(x_arg, prepared["w1"], prepared["b1"], prepared["w2"],
      prepared["b2"], prepared["w3"], prepared["b3"])

    return out_padded[:, :O]


def init_mlp_params(key, n_hidden, n_nodes, output_size=1):
    """torch.nn.Linear-style init; PyTorch-native layout (w [out,in], b [out])."""
    input_size = int(2 * n_nodes ** 2)
    sizes = [(n_hidden, input_size), (n_hidden, n_hidden),
             (output_size, n_hidden)]
    params = {}
    for i, (fan_out, fan_in) in enumerate(sizes, start=1):
        key, kw, kb = jax.random.split(key, 3)
        bound = 1.0 / (fan_in ** 0.5)
        params[f"w{i}"] = jax.random.uniform(
            kw, (fan_out, fan_in), jnp.float32, -bound, bound)
        params[f"b{i}"] = jax.random.uniform(
            kb, (fan_out,), jnp.float32, -bound, bound)
    return params


def mlp_reference(x, params, *, softmax=False):
    h = jnp.maximum(x @ params["w1"].T + params["b1"], 0.0)
    h = jnp.maximum(h @ params["w2"].T + params["b2"], 0.0)
    out = h @ params["w3"].T + params["b3"]
    if softmax:
        out = jax.nn.softmax(out, axis=0)
    return out


if __name__ == "__main__":
    ok = True

    # Config 1: the module's natural small shape (n_nodes=8 -> F=128), n_k=1.
    # Config 2: larger F with a deliberately tiny tk_max so the multi-step
    #           reduction / accumulator / resident-x slicing path is exercised.
    configs = [
        dict(n_nodes=8, n_hidden=32, output_size=1, batch=2, tk_max=8192),
        dict(n_nodes=16, n_hidden=32, output_size=1, batch=2, tk_max=128),
    ]

    for cfg in configs:
        key = jax.random.PRNGKey(0)
        key, kx = jax.random.split(key)
        F = int(2 * cfg["n_nodes"] ** 2)
        x = jax.random.normal(kx, (cfg["batch"], F), dtype=jnp.float32)

        params = init_mlp_params(key, cfg["n_hidden"], cfg["n_nodes"],
                                 cfg["output_size"])
        # Weight pad/cast hoisted out of the forward path (run once).
        prepared, meta = prepare_mlp_params(params, cfg["batch"],
                                            tk_max=cfg["tk_max"])

        for use_softmax in (False, True):
            out = jax.block_until_ready(
                mlp_forward(x, prepared, meta, softmax=use_softmax))
            ref = mlp_reference(x, params, softmax=use_softmax)
            assert out.shape == (cfg["batch"], cfg["output_size"])
            # bf16 matmul inputs with f32 accumulation -> loose-but-safe
            # tolerance against the pure-f32 reference.
            ok = ok and bool(jnp.allclose(out, ref, atol=5e-2, rtol=5e-2))

    assert ok, "mismatch vs reference"
    print("KERNEL_OK")
</pallas_src>

<mosaic_0001>
module attributes {stable_mosaic.version = 11 : i64} {
  func.func @_mlp_kernel(%arg0: i32, %arg1: memref<1x2x128xbf16, #tpu.memory_space<vmem>>, %arg2: memref<32x128xbf16, #tpu.memory_space<vmem>>, %arg3: memref<1x32xf32, #tpu.memory_space<vmem>>, %arg4: memref<32x32xbf16, #tpu.memory_space<vmem>>, %arg5: memref<1x32xf32, #tpu.memory_space<vmem>>, %arg6: memref<32x128xbf16, #tpu.memory_space<vmem>>, %arg7: memref<1x128xf32, #tpu.memory_space<vmem>>, %arg8: memref<2x128xf32, #tpu.memory_space<vmem>>, %arg9: memref<2x32xf32, #tpu.memory_space<vmem>>) attributes {dimension_semantics = [#tpu.dimension_semantics<arbitrary>], iteration_bounds = array<i64: 1>, scalar_prefetch = 0 : i64, scratch_operands = 1 : i64, tpu.core_type = #tpu.core_type<tc>, window_params = [{pipeline_mode = #tpu.pipeline_mode<synchronous>, transform_indices = @transform_0, window_bounds = array<i64: 1, 2, 128>}, {transform_indices = @transform_1, window_bounds = array<i64: 32, 128>}, {pipeline_mode = #tpu.pipeline_mode<synchronous>, transform_indices = @transform_2, window_bounds = array<i64: 1, 32>}, {pipeline_mode = #tpu.pipeline_mode<synchronous>, transform_indices = @transform_3, window_bounds = array<i64: 32, 32>}, {pipeline_mode = #tpu.pipeline_mode<synchronous>, transform_indices = @transform_4, window_bounds = array<i64: 1, 32>}, {pipeline_mode = #tpu.pipeline_mode<synchronous>, transform_indices = @transform_5, window_bounds = array<i64: 32, 128>}, {pipeline_mode = #tpu.pipeline_mode<synchronous>, transform_indices = @transform_6, window_bounds = array<i64: 1, 128>}, {pipeline_mode = #tpu.pipeline_mode<synchronous>, transform_indices = @transform_7, window_bounds = array<i64: 2, 128>}]} {
    %c0_i32 = arith.constant 0 : i32
    %0 = arith.cmpi eq, %arg0, %c0_i32 : i32
    %1 = arith.extui %0 : i1 to i32
    %c0_i32_0 = arith.constant 0 : i32
    %2 = arith.cmpi ne, %1, %c0_i32_0 : i32
    scf.if %2 {
      %c0_10 = arith.constant 0 : index
      %c0_11 = arith.constant 0 : index
      %14 = vector.load %arg3[%c0_10, %c0_11] : memref<1x32xf32, #tpu.memory_space<vmem>>, vector<1x32xf32>
      %15 = vector.shape_cast %14 : vector<1x32xf32> to vector<1x32xf32>
      %16 = vector.broadcast %15 : vector<1x32xf32> to vector<2x32xf32>
      %c0_12 = arith.constant 0 : index
      %c0_13 = arith.constant 0 : index
      %17 = vector.load %arg9[%c0_12, %c0_13] : memref<2x32xf32, #tpu.memory_space<vmem>>, vector<2x32xf32>
      tpu.vector_store %arg9[%c0_12, %c0_13], %16 {strides = array<i32>} : memref<2x32xf32, #tpu.memory_space<vmem>>, vector<2x32xf32>,
    } else {
    }
    %3 = arith.index_cast %arg0 : i32 to index
    %c0 = arith.constant 0 : index
    %c0_1 = arith.constant 0 : index
    %4 = vector.load %arg1[%3, %c0, %c0_1] : memref<1x2x128xbf16, #tpu.memory_space<vmem>>, vector<1x2x128xbf16>
    %5 = vector.shape_cast %4 : vector<1x2x128xbf16> to vector<2x128xbf16>
    %c0_2 = arith.constant 0 : index
    %c0_3 = arith.constant 0 : index
    %6 = vector.load %arg9[%c0_2, %c0_3] : memref<2x32xf32, #tpu.memory_space<vmem>>, vector<2x32xf32>
    %c0_4 = arith.constant 0 : index
    %c0_5 = arith.constant 0 : index
    %7 = vector.load %arg2[%c0_4, %c0_5] : memref<32x128xbf16, #tpu.memory_space<vmem>>, vector<32x128xbf16>
    %cst = arith.constant dense<0.000000e+00> : vector<2x32xf32>
    %8 = tpu.matmul %5, %7, %cst {dimension_numbers = #tpu.dot_dimension_numbers<[1], [1], [0], [0], [0, 0, 1, 0], [], []>} : vector<2x128xbf16>, vector<32x128xbf16>, vector<2x32xf32> -> vector<2x32xf32>
    %9 = arith.addf %6, %8 : vector<2x32xf32>
    %c0_6 = arith.constant 0 : index
    %c0_7 = arith.constant 0 : index
    %10 = vector.load %arg9[%c0_6, %c0_7] : memref<2x32xf32, #tpu.memory_space<vmem>>, vector<2x32xf32>
    tpu.vector_store %arg9[%c0_6, %c0_7], %9 {strides = array<i32>} : memref<2x32xf32, #tpu.memory_space<vmem>>, vector<2x32xf32>,
    %c0_i32_8 = arith.constant 0 : i32
    %11 = arith.cmpi eq, %arg0, %c0_i32_8 : i32
    %12 = arith.extui %11 : i1 to i32
    %c0_i32_9 = arith.constant 0 : i32
    %13 = arith.cmpi ne, %12, %c0_i32_9 : i32
    scf.if %13 {
      %c0_10 = arith.constant 0 : index
      %c0_11 = arith.constant 0 : index
      %14 = vector.load %arg9[%c0_10, %c0_11] : memref<2x32xf32, #tpu.memory_space<vmem>>, vector<2x32xf32>
      %cst_12 = arith.constant 0.000000e+00 : f32
      %15 = vector.broadcast %cst_12 : f32 to vector<2x32xf32>
      %16 = arith.maximumf %14, %15 : vector<2x32xf32>
      %17 = arith.truncf %16 : vector<2x32xf32> to vector<2x32xbf16>
      %c0_13 = arith.constant 0 : index
      %c0_14 = arith.constant 0 : index
      %18 = vector.load %arg4[%c0_13, %c0_14] : memref<32x32xbf16, #tpu.memory_space<vmem>>, vector<32x32xbf16>
      %cst_15 = arith.constant dense<0.000000e+00> : vector<2x32xf32>
      %19 = tpu.matmul %17, %18, %cst_15 {dimension_numbers = #tpu.dot_dimension_numbers<[1], [0], [0], [1], [0, 0, 1, 1], [], []>} : vector<2x32xbf16>, vector<32x32xbf16>, vector<2x32xf32> -> vector<2x32xf32>
      %c0_16 = arith.constant 0 : index
      %c0_17 = arith.constant 0 : index
      %20 = vector.load %arg5[%c0_16, %c0_17] : memref<1x32xf32, #tpu.memory_space<vmem>>, vector<1x32xf32>
      %21 = vector.broadcast %20 : vector<1x32xf32> to vector<2x32xf32>
      %22 = arith.addf %19, %21 : vector<2x32xf32>
      %cst_18 = arith.constant 0.000000e+00 : f32
      %23 = vector.broadcast %cst_18 : f32 to vector<2x32xf32>
      %24 = arith.maximumf %22, %23 : vector<2x32xf32>
      %25 = arith.truncf %24 : vector<2x32xf32> to vector<2x32xbf16>
      %c0_19 = arith.constant 0 : index
      %c0_20 = arith.constant 0 : index
      %26 = vector.load %arg6[%c0_19, %c0_20] : memref<32x128xbf16, #tpu.memory_space<vmem>>, vector<32x128xbf16>
      %cst_21 = arith.constant dense<0.000000e+00> : vector<2x128xf32>
      %27 = tpu.matmul %25, %26, %cst_21 {dimension_numbers = #tpu.dot_dimension_numbers<[1], [0], [0], [1], [0, 0, 1, 1], [], []>} : vector<2x32xbf16>, vector<32x128xbf16>, vector<2x128xf32> -> vector<2x128xf32>
      %c0_22 = arith.constant 0 : index
      %c0_23 = arith.constant 0 : index
      %28 = vector.load %arg7[%c0_22, %c0_23] : memref<1x128xf32, #tpu.memory_space<vmem>>, vector<1x128xf32>
      %29 = vector.broadcast %28 : vector<1x128xf32> to vector<2x128xf32>
      %30 = arith.addf %27, %29 : vector<2x128xf32>
      %c0_24 = arith.constant 0 : index
      %c0_25 = arith.constant 0 : index
      %31 = vector.load %arg8[%c0_24, %c0_25] : memref<2x128xf32, #tpu.memory_space<vmem>>, vector<2x128xf32>
      tpu.vector_store %arg8[%c0_24, %c0_25], %30 {strides = array<i32>} : memref<2x128xf32, #tpu.memory_space<vmem>>, vector<2x128xf32>,
    } else {
    }
    return
  }
  func.func @transform_0(%arg0: i32) -> (i32, i32, i32) {
    %c0_i32 = arith.constant 0 : i32
    %c0_i32_0 = arith.constant 0 : i32
    %c0_i32_1 = arith.constant 0 : i32
    %c0_i32_2 = arith.constant 0 : i32
    return %c0_i32, %c0_i32_0, %c0_i32_1 : i32, i32, i32
  }
  func.func @transform_1(%arg0: i32) -> (i32, i32) {
    %c0_i32 = arith.constant 0 : i32
    %c0_i32_0 = arith.constant 0 : i32
    return %c0_i32, %arg0 : i32, i32
  }
  func.func @transform_2(%arg0: i32) -> (i32, i32) {
    %c0_i32 = arith.constant 0 : i32
    %c0_i32_0 = arith.constant 0 : i32
    %c0_i32_1 = arith.constant 0 : i32
    return %c0_i32, %c0_i32_0 : i32, i32
  }
  func.func @transform_3(%arg0: i32) -> (i32, i32) {
    %c0_i32 = arith.constant 0 : i32
    %c0_i32_0 = arith.constant 0 : i32
    %c0_i32_1 = arith.constant 0 : i32
    return %c0_i32, %c0_i32_0 : i32, i32
  }
  func.func @transform_4(%arg0: i32) -> (i32, i32) {
    %c0_i32 = arith.constant 0 : i32
    %c0_i32_0 = arith.constant 0 : i32
    %c0_i32_1 = arith.constant 0 : i32
    return %c0_i32, %c0_i32_0 : i32, i32
  }
  func.func @transform_5(%arg0: i32) -> (i32, i32) {
    %c0_i32 = arith.constant 0 : i32
    %c0_i32_0 = arith.constant 0 : i32
    %c0_i32_1 = arith.constant 0 : i32
    return %c0_i32, %c0_i32_0 : i32, i32
  }
  func.func @transform_6(%arg0: i32) -> (i32, i32) {
    %c0_i32 = arith.constant 0 : i32
    %c0_i32_0 = arith.constant 0 : i32
    %c0_i32_1 = arith.constant 0 : i32
    return %c0_i32, %c0_i32_0 : i32, i32
  }
  func.func @transform_7(%arg0: i32) -> (i32, i32) {
    %c0_i32 = arith.constant 0 : i32
    %c0_i32_0 = arith.constant 0 : i32
    %c0_i32_1 = arith.constant 0 : i32
    return %c0_i32, %c0_i32_0 : i32, i32
  }
}

</mosaic_0001>

<bundles_post_ra>
// kernel: tpu_custom_call.1
= control target key start
LH: loop header
LB: loop body
LE: loop exit
PB: predicated region body
PF: predicated region fallthrough
CT: control target
= control target key end

     0   :  { %12 = vsyncpa [#allocation4], 0  ;;  %s570_s0 = inlined_call_operand.hbm [shape: bf16[1,2,128], index: 0, kind: input, shape index: {}]   ;;  %s571_s1 = inlined_call_operand.hbm [shape: bf16[32,128], index: 1, kind: input, shape index: {}]   ;;  %s572_s2 = inlined_call_operand.vmem [shape: f32[1,32], index: 2, kind: input, shape index: {}]   ;;  %s573_s3 = inlined_call_operand.hbm [shape: bf16[32,32], index: 3, kind: input, shape index: {}]   ;;  %s574_s4 = inlined_call_operand.vmem [shape: f32[1,32], index: 4, kind: input, shape index: {}]   ;;  %s575_s5 = inlined_call_operand.hbm [shape: bf16[32,128], index: 5, kind: input, shape index: {}]   ;;  %s576_s6 = inlined_call_operand.vmem [shape: f32[1,128], index: 6, kind: input, shape index: {}]   ;;  %s577_s7 = inlined_call_operand.hbm [shape: f32[2,128], index: 7, kind: output, shape index: {}]  }
   0x1   :  { %13 = vsyncpa [#allocation7], 0 }
   0x2   :  { %14 = vsyncpa [#allocation10], 0 }
   0x3   :  { %15 = vsyncpa [#allocation5], 0  ;;  %s481_s24 = smov [#allocation6]  }
   0x4   :  { %s31_s25 = sshll.u32 %s481_s24, 4  ;;  %s32_s25 = int_to_ptr.vmem [resolvable:$true] %s31_s25 }
   0x5   :  { %s381_s26 = scalar_lea.vmem %s32_s25, 256  ;;  %p386_p1 = scmp.lt.s32.totalorder %s32_s25, %s32_s25 }
   0x6   :  { %p382_p0 = scmp.ne.s32.totalorder %s32_s25, %s381_s26  ;;  %p387_p2 = scmp.lt.s32.totalorder %s381_s26, %s381_s26 }
   0x8   :  { %p388_p3 = por %p387_p2, %p386_p1 }
   0xa   :  { %p389_p4 = pnand %p388_p3, %p382_p0 }
   0xc   :  { %392 = shalt.err (!%p389_p4)
}
   0xd   :  { %s482_s27 = smov 64   ;;  %s483_s28 = smov 4  }
   0xe   :  { %37 = dma.hbm_to_vmem [thread:$0]  %s571_s1, 256, %s32_s25, [#allocation7], %s482_s27, %s482_s27, %s483_s28  }
   0xf   :  { %s484_s8 = smov [#allocation3]   ;;  %s485_s10 = smov [#allocation8]  }
  0x10   :  { %s22_s9 = sshll.u32 %s484_s8, 4  ;;  %s45_s11 = sshll.u32 %s485_s10, 4  ;;  %s23_s9 = int_to_ptr.vmem [resolvable:$true] %s22_s9  ;;  %s46_s11 = int_to_ptr.vmem [resolvable:$true] %s45_s11 }
  0x11   :  { %s401_s12 = scalar_lea.vmem %s23_s9, 16  ;;  %s405_s13 = scalar_lea.vmem %s23_s9, 32 }
  0x12   :  { %p402_p5 = scmp.ne.s32.totalorder %s23_s9, %s401_s12  ;;  %p406_p6 = scmp.lt.s32.totalorder %s23_s9, %s23_s9 }
  0x13   :  { %p407_p7 = scmp.lt.s32.totalorder %s405_s13, %s401_s12 }
  0x15   :  { %p408_p8 = por %p407_p7, %p406_p6 }
  0x17   :  { %p409_p9 = pnand %p408_p8, %p402_p5 }
  0x19   :  { %412 = shalt.err (!%p409_p9)
}
  0x1a   :  { %25 = dma.hbm_to_vmem [thread:$0]  %s570_s0, 16, %s23_s9, [#allocation4]  }
  0x1b   :  { %s421_s16 = scalar_lea.vmem %s46_s11, 256  ;;  %p426_p11 = scmp.lt.s32.totalorder %s46_s11, %s46_s11 }
  0x1c   :  { %p422_p10 = scmp.ne.s32.totalorder %s46_s11, %s421_s16  ;;  %p427_p12 = scmp.lt.s32.totalorder %s421_s16, %s421_s16 }
  0x1e   :  { %p428_p13 = por %p427_p12, %p426_p11 }
  0x20   :  { %p429_p0 = pnand %p428_p13, %p422_p10 }
  0x22   :  { %432 = shalt.err (!%p429_p0)
}
  0x23   :  { %51 = dma.hbm_to_vmem [thread:$0]  %s573_s3, 256, %s46_s11, [#allocation7], %s482_s27, %s482_s27, %s483_s28  }
  0x24   :  { %s486_s18 = smov [#allocation9]  }
  0x25   :  { %s59_s19 = sshll.u32 %s486_s18, 4  ;;  %s60_s19 = int_to_ptr.vmem [resolvable:$true] %s59_s19 }
  0x26   :  { %s441_s20 = scalar_lea.vmem %s60_s19, 256  ;;  %p446_p2 = scmp.lt.s32.totalorder %s60_s19, %s60_s19 }
  0x27   :  { %p442_p1 = scmp.ne.s32.totalorder %s60_s19, %s441_s20  ;;  %p447_p3 = scmp.lt.s32.totalorder %s441_s20, %s441_s20 }
  0x29   :  { %p448_p4 = por %p447_p3, %p446_p2 }
  0x2b   :  { %p449_p5 = pnand %p448_p4, %p442_p1 }
  0x2d   :  { %452 = shalt.err (!%p449_p5)
}
  0x2e   :  { %65 = dma.hbm_to_vmem [thread:$0]  %s575_s5, 256, %s60_s19, [#allocation10], %s482_s27, %s482_s27, %s483_s28  }
  0x2f   :  { %473 = dma.done.wait [#allocation4], 16  }
  0x30   :  { %474 = vsyncadd [#allocation4], 4294967280 }
  0x31   :  { %475 = dma.done.wait [#allocation7], 512  }
  0x32   :  { %476 = vsyncadd [#allocation7], 4294966784 }
  0x33   :  { %477 = dma.done.wait [#allocation10], 256  }
  0x34   :  { %478 = vsyncadd [#allocation10], 4294967040  ;;  %v487_v0 = vmov 0.0   ;;  %vm488_vm0 = vmmov 0   ;;  %v367_v1 = vld [vmem:[#allocation6 + $0x8] sm:$0xff]   ;;  %vm92_vm1 = vcmask 254976  }
  0x35   :  { %334 = vmatprep.subr.bf16.mxu0 %v487_v0  ;;  %338 = vmatprep.mubr.msk.bf16.mxu0 %vm488_vm0, %v487_v0  ;;  %v314_v2 = vld [vmem:[%s572_s2] ss:$0 sm:$0xff]  ;;  %v368_v3 = vld [vmem:[#allocation6] sm:$0xff]   ;;  %v94_v4 = vld [vmem:[#allocation3] sm:$0x1]  ;;  %vm184_vm2 = vcmask 261120  }
  0x36   :  { %342 = vmatprep.subr.bf16.mxu1 %v487_v0  ;;  %346 = vmatprep.mubr.msk.bf16.mxu1 %vm488_vm0, %v487_v0  ;;  %93 = vst.msk [vmem:[#allocation2] sm:$0x3] %vm92_vm1, %v314_v2  ;;  %v369_v5 = vld [vmem:[#allocation8 + $0x8] sm:$0xff]   ;;  %v370_v6 = vld [vmem:[#allocation8] sm:$0xff]   ;;  %v371_v15 = vld [vmem:[#allocation9 + $0x8] sm:$0xff]   ;;  %s489_s25 = smov [#allocation11]  }
  0x37   :  { %335 = vmatpush3.bf16.xpose.msra.mxu0 %v367_v1  ;;  %343 = vmatpush3.bf16.msra.mxu1 %v369_v5  ;;  %v372_v17 = vld [vmem:[#allocation9] sm:$0xff]   ;;  %v317_v18 = vld [vmem:[%s574_s4] ss:$0 sm:$0xff]  ;;  %s303_s26 = sshll.u32 %s489_s25, 4  ;;  %s304_s26 = int_to_ptr.vmem [resolvable:$true] %s303_s26 }
  0x38   :  { %336 = vmatprep.subr.bf16.mxu0 %v487_v0  ;;  %344 = vmatprep.subr.bf16.mxu1 %v487_v0  ;;  %v321_v26 = vld [vmem:[%s576_s6] ss:$0 sm:$0xff]  ;;  %s453_s4 = scalar_lea.vmem %s304_s26, 32  ;;  %p458_p7 = scmp.lt.s32.totalorder %s304_s26, %s304_s26 }
  0x39   :  { %p454_p6 = scmp.ne.s32.totalorder %s304_s26, %s453_s4  ;;  %p459_p8 = scmp.lt.s32.totalorder %s453_s4, %s453_s4 }
  0x3b   :  { %345 = vmatpush3.bf16.msra.mxu1 %v370_v6  ;;  %p460_p9 = por %p459_p8, %p458_p7 }
  0x3c   :  { %350 = vmatprep.subr.bf16.mxu1 %v487_v0 }
  0x3d   :  { %v95_v7 = vld [vmem:[#allocation2] sm:$0x3]  ;;  %p461_p10 = pnand %p460_p9, %p454_p6 }
  0x3f   :  { %337 = vmatpush3.bf16.xpose.msra.mxu0 %v368_v3 }
  0x46   :  { %339 = vmatmul.mubr.bf16.vlgmr.msra.gmra.mxu0 %v94_v4 }
 0x106   :  { %v146_v8 = vpop.f32.mrf.mxu0 }
 0x107   :  { %v152_v9 = vadd.f32 %v146_v8, %v95_v7 }
 0x108   :  { %v340_v10 = vpop.f32.mrf.mxu0 }
 0x109   :  { %154 = vst.msk [vmem:[#allocation2] sm:$0x3] %vm92_vm1, %v152_v9 }
 0x10a   :  { %v149_v11 = vpop.f32.mrf.mxu0 }
 0x10c   :  { %v341_v12 = vpop.f32.mrf.mxu0 }
 0x110   :  { %v158_v13 = vld [vmem:[#allocation2] sm:$0x3] }
 0x111   :  { %v159_v14 = vmax.f32 %v158_v13, 0.0 }
 0x113   :  { %v160_v16 = vpack.c.bf16 %v159_v14, %v159_v14 }
 0x115   :  { %347 = vmatmul.mubr.msk.bf16.vlgmr.msra.gmra.mxu1 %vm184_vm2, %v160_v16 }
 0x116   :  { %351 = vmatpush3.bf16.msra.mxu1 %v371_v15  ;;  %354 = vmatprep.mubr.msk.bf16.mxu1 %vm488_vm0, %v487_v0 }
 0x117   :  { %352 = vmatprep.subr.bf16.mxu1 %v487_v0 }
 0x11a   :  { %353 = vmatpush3.bf16.msra.mxu1 %v372_v17 }
 0x1d5   :  { %v222_v19 = vpop.f32.mrf.mxu1 }
 0x1d6   :  { %v223_v20 = vadd.f32 %v317_v18, %v222_v19 }
 0x1d7   :  { %v348_v21 = vpop.f32.mrf.mxu1 }
 0x1d8   :  { %v228_v22 = vmax.f32 %v223_v20, 0.0 }
 0x1d9   :  { %v225_v23 = vpop.f32.mrf.mxu1 }
 0x1da   :  { %v229_v24 = vpack.c.bf16 %v228_v22, %v228_v22 }
 0x1db   :  { %v349_v25 = vpop.f32.mrf.mxu1 }
 0x1dc   :  { %355 = vmatmul.mubr.msk.bf16.vlgmr.msra.gmra.mxu1 %vm184_vm2, %v229_v24 }
 0x29c   :  { %v290_v27 = vpop.f32.mrf.mxu1 }
 0x29d   :  { %v291_v28 = vadd.f32 %v321_v26, %v290_v27 }
 0x29e   :  { %v356_v29 = vpop.f32.mrf.mxu1 }
 0x29f   :  { %296 = vst [vmem:[#allocation11] sm:$0x3] %v291_v28 }
 0x2a0   :  { %v293_v30 = vpop.f32.mrf.mxu1 }
 0x2a1   :  { %464 = shalt.err (!%p461_p10)
}
 0x2a2   :  { %306 = dma.vmem_to_hbm [thread:$0]  %s304_s26, 32, %s577_s7, [#allocation5]   ;;  %v357_v31 = vpop.f32.mrf.mxu1 }
 0x2a3   :  { %479 = dma.done.wait [#allocation5], 32  }
 0x2a4   :  { %480 = vsyncadd [#allocation5], 4294967264 }
 0x2a5   :  { %310 = vsyncpa [#allocation4], 1 }
 0x2a6   :  { %311 = vsyncpa [#allocation7], 1 }
 0x2a7   :  { %312 = vsyncpa [#allocation10], 1 }
 0x2a8   :  { %313 = vsyncpa [#allocation5], 1 }

</bundles_post_ra>
